<compile_context>
chip_gen: v7x
topology: tpu7x:2x2x1
jax: 0.10.0
libtpu: 0.0.40
codegen_flags: <defaults>
</compile_context>

<pallas_src>
import jax
import jax.numpy as jnp
from jax.experimental import pallas as pl
from jax.experimental.pallas import tpu as pltpu


def _sublane_rows(dtype) -> int:
    """Dtype-native sublane multiple: 8 rows (32-bit), 16 (16-bit), 32 (8-bit)."""
    return max(8, 32 // jnp.dtype(dtype).itemsize)


def _concat_kernel_2d(x_ref, pe_ref, out_ref):
    """out[s, :] = concat(x[s, :], pe[s, :]) with the batch dim squeezed out.

    x_ref:   (TS, Dx)
    pe_ref:  (TS, Dp)  when PE is tiled per seq block, or
             (S,  Dp)  when the full table is VMEM-resident (slice in-kernel).
    out_ref: (TS, Dx + Dp) -- single fused full-width store.
    """
    ts = x_ref.shape[0]
    if pe_ref.shape[0] == ts:                       # tiled PE (or full-seq tile)
        pe = pe_ref[...]
    else:                                           # resident table: this tile's rows
        start = pl.multiple_of(pl.program_id(0) * ts, ts)
        pe = pe_ref[pl.ds(start, ts), :]
    out_ref[...] = jnp.concatenate([x_ref[...], pe], axis=-1)


def _concat_kernel_3d(x_ref, pe_ref, out_ref):
    """Several batch rows per step: broadcast the resident PE table over them.

    x_ref: (Bt, S, Dx), pe_ref: (S, Dp), out_ref: (Bt, S, Dx + Dp).
    """
    bt, s, _ = x_ref.shape
    pe = jnp.broadcast_to(pe_ref[...][None, :, :], (bt, s, pe_ref.shape[-1]))
    out_ref[...] = jnp.concatenate([x_ref[...], pe], axis=-1)


def positional_embedding(x, pe_table, *, tile_rows=2048,
                         target_step_bytes=2 * 1024 * 1024,
                         vmem_budget_bytes=12 * 1024 * 1024):
    """x: (B, S, D_x); pe_table: (max_len, pe_dim) with S == max_len.
    Returns (B, S, D_x + pe_dim), matching PositionalEmbedding.forward."""
    B, S, Dx = x.shape
    max_len, Dp = pe_table.shape
    if S != max_len:
        raise ValueError(f"forward() requires x.size(1) == max_len ({S} != {max_len})")
    if x.dtype != pe_table.dtype:
        # torch.cat would raise on mismatched dtypes; do not silently cast.
        raise TypeError(f"x dtype {x.dtype} != pe_table dtype {pe_table.dtype}")

    itemsize = jnp.dtype(x.dtype).itemsize
    sub = _sublane_rows(x.dtype)
    row_x = Dx * itemsize
    row_pe = Dp * itemsize
    row_out = (Dx + Dp) * itemsize
    step_row_bytes = row_x + row_out              # HBM traffic per output row

    # Rows per step so each step moves >= target bytes (amortize ~0.35us/step),
    # capped so the double-buffered x/out/pe tiles stay inside the VMEM budget
    # (budget < v5e's 16 MiB scoped default, so no vmem_limit override needed).
    rows_target = -(-target_step_bytes // step_row_bytes) if target_step_bytes else 0
    rows_vmem = max(sub, vmem_budget_bytes // (2 * (row_x + row_out + row_pe)))
    ts = min(S, max(tile_rows, rows_target), rows_vmem)
    if ts < S:
        ts = max(sub, (ts // sub) * sub)          # dtype-native sublane alignment
    n_s = pl.cdiv(S, ts)

    pe_bytes = S * Dp * itemsize
    pe_resident = (ts == S) or (
        S % ts == 0                                # no OOB risk on a tail tile
        and pe_bytes <= 4 * 1024 * 1024
        and 2 * ts * (row_x + row_out) + 2 * pe_bytes <= vmem_budget_bytes)

    # If the whole sequence fits in one tile but a step is still tiny, block
    # several batch rows per step instead (keeps per-step bytes near the target).
    bt = 1
    if ts == S and B > 1:
        seq_bytes = S * step_row_bytes
        if seq_bytes < target_step_bytes:
            bt_vmem = max(1, (vmem_budget_bytes - 2 * pe_bytes)
                          // (2 * S * (row_x + row_out)))
            bt = max(1, min(B, -(-target_step_bytes // seq_bytes), bt_vmem))

    out_shape = jax.ShapeDtypeStruct((B, S, Dx + Dp), x.dtype)

    if bt == 1:
        # Seq tiles outer, batch inner: PE block index is constant across the
        # inner batch axis (no re-DMA).  Batch dim squeezed -> 2-D kernel refs.
        grid = (n_s, B)
        x_spec = pl.BlockSpec((pl.Squeezed(), ts, Dx), lambda s, b: (b, s, 0))
        out_spec = pl.BlockSpec((pl.Squeezed(), ts, Dx + Dp), lambda s, b: (b, s, 0))
        if pe_resident:
            pe_spec = pl.BlockSpec((S, Dp), lambda s, b: (0, 0))
        else:
            pe_spec = pl.BlockSpec((ts, Dp), lambda s, b: (s, 0))
        kernel = _concat_kernel_2d
        dims = ("parallel", "parallel")
    else:
        # Whole sequence per step, Bt batch rows blocked together; PE table is a
        # single resident block.
        grid = (pl.cdiv(B, bt),)
        x_spec = pl.BlockSpec((bt, S, Dx), lambda b: (b, 0, 0))
        out_spec = pl.BlockSpec((bt, S, Dx + Dp), lambda b: (b, 0, 0))
        pe_spec = pl.BlockSpec((S, Dp), lambda b: (0, 0))
        kernel = _concat_kernel_3d
        dims = ("parallel",)

    return pl.pallas_call(
        kernel,
        out_shape=out_shape,
        grid_spec=pltpu.PrefetchScalarGridSpec(
            num_scalar_prefetch=0,
            grid=grid,
            in_specs=[x_spec, pe_spec],
            out_specs=out_spec),
        compiler_params=pltpu.CompilerParams(dimension_semantics=dims),
    )(x, pe_table)


if __name__ == "__main__":
    key = jax.random.PRNGKey(0)
    k_x, k_pe, k_x2, k_pe2 = jax.random.split(key, 4)

    # Test 1: module-sized shapes (batch=2, max_len=8, hidden=32, pe_dim=32).
    # Whole sequence fits in one tile -> batch rows blocked together (3-D path).
    B, S, Dx, Dp = 2, 8, 32, 32
    x = jax.random.normal(k_x, (B, S, Dx), dtype=jnp.float32)
    pe = jax.random.normal(k_pe, (S, Dp), dtype=jnp.float32)  # nn.Embedding weight
    out = jax.block_until_ready(positional_embedding(x, pe))
    ref = jnp.concatenate([x, jnp.broadcast_to(pe[None], (B, S, Dp))], axis=2)
    assert out.shape == (B, S, Dx + Dp)
    assert jnp.allclose(out, ref)

    # Test 2: longer sequence with small forced tiles -> exercises the seq-tiled
    # 2-D path with the PE table held fully VMEM-resident and sliced in-kernel.
    B2, S2 = 2, 1024
    x2 = jax.random.normal(k_x2, (B2, S2, Dx), dtype=jnp.float32)
    pe2 = jax.random.normal(k_pe2, (S2, Dp), dtype=jnp.float32)
    out2 = jax.block_until_ready(
        positional_embedding(x2, pe2, tile_rows=256, target_step_bytes=0))
    ref2 = jnp.concatenate([x2, jnp.broadcast_to(pe2[None], (B2, S2, Dp))], axis=2)
    assert out2.shape == (B2, S2, Dx + Dp)
    assert jnp.allclose(out2, ref2)

    print("KERNEL_OK")
</pallas_src>

<mosaic_0001>
module attributes {stable_mosaic.version = 11 : i64} {
  func.func @_concat_kernel_3d(%arg0: i32, %arg1: memref<2x8x32xf32, #tpu.memory_space<vmem>>, %arg2: memref<8x32xf32, #tpu.memory_space<vmem>>, %arg3: memref<2x8x64xf32, #tpu.memory_space<vmem>>) attributes {dimension_semantics = [#tpu.dimension_semantics<parallel>], iteration_bounds = array<i64: 1>, scalar_prefetch = 0 : i64, scratch_operands = 0 : i64, tpu.core_type = #tpu.core_type<tc>, window_params = [{transform_indices = @transform_0, window_bounds = array<i64: 2, 8, 32>}, {pipeline_mode = #tpu.pipeline_mode<synchronous>, transform_indices = @transform_1, window_bounds = array<i64: 8, 32>}, {transform_indices = @transform_2, window_bounds = array<i64: 2, 8, 64>}]} {
    %c0 = arith.constant 0 : index
    %c0_0 = arith.constant 0 : index
    %0 = vector.load %arg2[%c0, %c0_0] : memref<8x32xf32, #tpu.memory_space<vmem>>, vector<8x32xf32>
    %1 = vector.shape_cast %0 : vector<8x32xf32> to vector<1x8x32xf32>
    %2 = vector.shape_cast %1 : vector<1x8x32xf32> to vector<1x8x32xf32>
    %3 = vector.broadcast %2 : vector<1x8x32xf32> to vector<2x8x32xf32>
    %c0_1 = arith.constant 0 : index
    %c0_2 = arith.constant 0 : index
    %c0_3 = arith.constant 0 : index
    %4 = vector.load %arg1[%c0_1, %c0_2, %c0_3] : memref<2x8x32xf32, #tpu.memory_space<vmem>>, vector<2x8x32xf32>
    %5 = tpu.concatenate %4, %3 in 2 : vector<2x8x32xf32>, vector<2x8x32xf32> -> vector<2x8x64xf32>
    %c0_4 = arith.constant 0 : index
    %c0_5 = arith.constant 0 : index
    %c0_6 = arith.constant 0 : index
    %6 = vector.load %arg3[%c0_4, %c0_5, %c0_6] : memref<2x8x64xf32, #tpu.memory_space<vmem>>, vector<2x8x64xf32>
    tpu.vector_store %arg3[%c0_4, %c0_5, %c0_6], %5 {strides = array<i32>} : memref<2x8x64xf32, #tpu.memory_space<vmem>>, vector<2x8x64xf32>,
    return
  }
  func.func @transform_0(%arg0: i32) -> (i32, i32, i32) {
    %c0_i32 = arith.constant 0 : i32
    %c0_i32_0 = arith.constant 0 : i32
    %c0_i32_1 = arith.constant 0 : i32
    return %arg0, %c0_i32, %c0_i32_0 : i32, i32, i32
  }
  func.func @transform_1(%arg0: i32) -> (i32, i32) {
    %c0_i32 = arith.constant 0 : i32
    %c0_i32_0 = arith.constant 0 : i32
    %c0_i32_1 = arith.constant 0 : i32
    return %c0_i32, %c0_i32_0 : i32, i32
  }
  func.func @transform_2(%arg0: i32) -> (i32, i32, i32) {
    %c0_i32 = arith.constant 0 : i32
    %c0_i32_0 = arith.constant 0 : i32
    %c0_i32_1 = arith.constant 0 : i32
    return %arg0, %c0_i32, %c0_i32_0 : i32, i32, i32
  }
}

</mosaic_0001>

<bundles_post_ra>
// kernel: tpu_custom_call.1
= control target key start
LH: loop header
LB: loop body
LE: loop exit
PB: predicated region body
PF: predicated region fallthrough
CT: control target
= control target key end

     0   :  { %7 = vsyncpa [#allocation3], 0  ;;  %s210_s0 = inlined_call_operand.hbm [shape: f32[2,8,32], index: 0, kind: input, shape index: {}]   ;;  %s211_s1 = inlined_call_operand.hbm [shape: f32[8,32], index: 1, kind: input, shape index: {}]   ;;  %s212_s2 = inlined_call_operand.hbm [shape: f32[2,8,64], index: 2, kind: output, shape index: {}]  }
   0x1   :  { %8 = vsyncpa [#allocation6], 0 }
   0x2   :  { %9 = vsyncpa [#allocation4], 0  ;;  %s147_s9 = smov [#allocation2]   ;;  %s75_s13 = scalar_lea.hbm %s210_s0, 256 }
   0x3   :  { %s15_s10 = sshll.u32 %s147_s9, 4  ;;  %p76_p0 = scmp.ne.s32.totalorder %s210_s0, %s75_s13  ;;  %s16_s10 = int_to_ptr.vmem [resolvable:$true] %s15_s10 }
   0x4   :  { %p79_p1 = scmp.lt.u32.totalorder %s75_s13, %s210_s0 }
   0x6   :  { %p81_p2 = pnand %p79_p1, %p76_p0 }
   0x8   :  { %84 = shalt.err (!%p81_p2)
}
   0x9   :  { %s85_s18 = scalar_lea.vmem %s16_s10, 256  ;;  %p90_p4 = scmp.lt.s32.totalorder %s16_s10, %s16_s10 }
   0xa   :  { %p86_p3 = scmp.ne.s32.totalorder %s16_s10, %s85_s18  ;;  %p91_p5 = scmp.lt.s32.totalorder %s85_s18, %s85_s18 }
   0xc   :  { %p92_p6 = por %p91_p5, %p90_p4 }
   0xe   :  { %p93_p7 = pnand %p92_p6, %p86_p3 }
  0x10   :  { %96 = shalt.err (!%p93_p7)
}
  0x11   :  { %s148_s19 = smov 128   ;;  %s149_s20 = smov 8  }
  0x12   :  { %21 = dma.hbm_to_vmem [thread:$0]  %s210_s0, 256, %s16_s10, [#allocation3], %s148_s19, %s148_s19, %s149_s20  }
  0x13   :  { %s150_s23 = smov [#allocation5]   ;;  %s97_s27 = scalar_lea.hbm %s211_s1, 128 }
  0x14   :  { %s28_s24 = sshll.u32 %s150_s23, 4  ;;  %p98_p8 = scmp.ne.s32.totalorder %s211_s1, %s97_s27  ;;  %s29_s24 = int_to_ptr.vmem [resolvable:$true] %s28_s24 }
  0x15   :  { %p101_p9 = scmp.lt.u32.totalorder %s97_s27, %s211_s1 }
  0x17   :  { %p103_p10 = pnand %p101_p9, %p98_p8 }
  0x19   :  { %106 = shalt.err (!%p103_p10)
}
  0x1a   :  { %s107_s4 = scalar_lea.vmem %s29_s24, 128  ;;  %p112_p12 = scmp.lt.s32.totalorder %s29_s24, %s29_s24 }
  0x1b   :  { %p108_p11 = scmp.ne.s32.totalorder %s29_s24, %s107_s4  ;;  %p113_p13 = scmp.lt.s32.totalorder %s107_s4, %s107_s4 }
  0x1d   :  { %p114_p0 = por %p113_p13, %p112_p12 }
  0x1f   :  { %p115_p1 = pnand %p114_p0, %p108_p11 }
  0x21   :  { %118 = shalt.err (!%p115_p1)
}
  0x22   :  { %31 = dma.hbm_to_vmem [thread:$0]  %s211_s1, 128, %s29_s24, [#allocation6]  }
  0x23   :  { %141 = dma.done.wait [#allocation3], 256  }
  0x24   :  { %142 = vsyncadd [#allocation3], 4294967040 }
  0x25   :  { %143 = dma.done.wait [#allocation6], 128  }
  0x26   :  { %144 = vsyncadd [#allocation6], 4294967168  ;;  %v38_v0 = vld [vmem:[#allocation5] sm:$0xff]  ;;  %s151_s6 = smov 32   ;;  %s152_s7 = smov [#allocation7]   ;;  %v39_v1 = vld [vmem:[#allocation2] sm:$0xff] }
  0x27   :  { %42 = vrot.lane.b32.xlu0 %v38_v0, %s151_s6  ;;  %s56_s8 = sshll.u32 %s152_s7, 4  ;;  %v40_v2 = vld [vmem:[#allocation2 + $0x8] sm:$0xff]  ;;  %vm45_vm0 = vcmask 261120   ;;  %vm48_vm1 = vcmask 523264   ;;  %s57_s8 = int_to_ptr.vmem [resolvable:$true] %s56_s8 }
  0x28   :  { %s119_s1 = scalar_lea.vmem %s57_s8, 256  ;;  %p124_p3 = scmp.lt.s32.totalorder %s57_s8, %s57_s8 }
  0x29   :  { %p120_p2 = scmp.ne.s32.totalorder %s57_s8, %s119_s1  ;;  %p125_p4 = scmp.lt.s32.totalorder %s119_s1, %s119_s1 }
  0x2b   :  { %p126_p5 = por %p125_p4, %p124_p3 }
  0x2d   :  { %p127_p6 = pnand %p126_p5, %p120_p2 }
  0x99   :  { %v43_v3 = vpop.permute.xlu0 %42 }
  0x9a   :  { %v46_v4 = vsel %vm45_vm0, %v39_v1, %v43_v3  ;;  %v47_v5 = vsel %vm45_vm0, %v40_v2, %v43_v3 }
  0x9b   :  { %49 = vst.msk [vmem:[#allocation7] sm:$0xff] %vm48_vm1, %v46_v4  ;;  %50 = vst.msk [vmem:[#allocation7 + $0x8] sm:$0xff] %vm48_vm1, %v47_v5 }
  0x9c   :  { %130 = shalt.err (!%p127_p6)
}
  0x9d   :  { %s131_s11 = scalar_lea.hbm %s212_s2, 256 }
  0x9e   :  { %p132_p7 = scmp.ne.s32.totalorder %s212_s2, %s131_s11  ;;  %p135_p8 = scmp.lt.u32.totalorder %s131_s11, %s212_s2 }
  0xa0   :  { %p137_p9 = pnand %p135_p8, %p132_p7 }
  0xa2   :  { %140 = shalt.err (!%p137_p9)
}
  0xa3   :  { %62 = dma.vmem_to_hbm [thread:$0]  %s57_s8, 256, %s212_s2, [#allocation4], %s148_s19, %s148_s19, %s149_s20  }
  0xa4   :  { %145 = dma.done.wait [#allocation4], 256  }
  0xa5   :  { %146 = vsyncadd [#allocation4], 4294967040 }
  0xa6   :  { %66 = vsyncpa [#allocation3], 1 }
  0xa7   :  { %67 = vsyncpa [#allocation6], 1 }
  0xa8   :  { %68 = vsyncpa [#allocation4], 1 }

</bundles_post_ra>
